<compile_context>
chip_gen: v7x
topology: tpu7x:2x2x1
jax: 0.10.0
libtpu: 0.0.40
codegen_flags: <defaults>
</compile_context>

<pallas_src>
import numpy as np
import jax
import jax.numpy as jnp
from jax import lax
from jax.experimental import pallas as pl
from jax.experimental.pallas import tpu as pltpu


# ----------------------------- activation fns ------------------------------
_SQRT1_2 = 0.7071067811865476


def _silu(x):
    return x * jax.nn.sigmoid(x)


def _gelu_exact(x):
    # PyTorch F.gelu default: 0.5 * x * (1 + erf(x / sqrt(2)))
    return 0.5 * x * (1.0 + lax.erf(x * _SQRT1_2))


def _relu(x):
    return jnp.maximum(x, 0.0)


_ACTIVATION_REGISTRY = {
    "silu": _silu,
    "gelu": _gelu_exact,
    "relu": _relu,
    "none": lambda z: z,
}
# Upcast to f32 only where transcendentals need it; relu/none stay native.
_NEEDS_F32 = {"silu": True, "gelu": True, "relu": False, "none": False}


def _activate(fn, needs_f32, x):
    """Apply fn; compute in f32 when required, return in x.dtype."""
    if needs_f32 and x.dtype != jnp.float32:
        return fn(x.astype(jnp.float32)).astype(x.dtype)
    return fn(x)


# ------------------------------ tiling policy -------------------------------
_VMEM_LIMIT_BYTES = 48 * 1024 * 1024      # <= v7x 64 MiB/TC, plenty on v5e/v6e
_BLOCK_BYTES_TARGET = 4 * 1024 * 1024     # per input block (Pallas double-buffers)
_ROW_TILE_CANDIDATES = (4096, 2048, 1024, 512, 256, 128, 64, 32, 16, 8)
_LANE_CANDIDATES = (4096, 2048, 1024, 512, 256, 128)

_COMPILER_PARAMS = pltpu.CompilerParams(
    dimension_semantics=("parallel",),
    vmem_limit_bytes=_VMEM_LIMIT_BYTES,
)


def _pick_row_tile(rows, row_bytes):
    """Largest multiple-of-8 row tile whose block fits the VMEM budget."""
    if rows <= 8:
        return rows              # block equals full (small) array -> allowed
    for t in _ROW_TILE_CANDIDATES:
        if t <= rows and t * row_bytes <= _BLOCK_BYTES_TARGET:
            return t
    return 8                     # extremely wide rows: smallest aligned tile


# -------------------------------- kernels -----------------------------------
def _make_eltwise_kernel(fn, needs_f32):
    def kernel(x_ref, o_ref):
        o_ref[...] = _activate(fn, needs_f32, x_ref[...]).astype(o_ref.dtype)
    return kernel


def _make_glu_split_kernel(fn, needs_f32):
    # gate/val arrive as two separately DMA'd, lane-aligned (tile, d) blocks.
    def kernel(gate_ref, val_ref, o_ref):
        act = _activate(fn, needs_f32, gate_ref[...])
        o_ref[...] = (val_ref[...] * act).astype(o_ref.dtype)
    return kernel


def _make_glu_fused_kernel(fn, needs_f32):
    # Fallback when D//2 is not a multiple of 128: slice inside the kernel.
    def kernel(x_ref, o_ref):
        x = x_ref[...]
        d = x.shape[-1] // 2
        act = _activate(fn, needs_f32, x[:, :d])
        o_ref[...] = (x[:, d:] * act).astype(o_ref.dtype)
    return kernel


# -------------------------------- wrapper ------------------------------------
def make_activation(name, glu=False):
    """Returns a callable mirroring Activation(name, glu=glu).forward."""
    fn = _ACTIVATION_REGISTRY[name]
    needs_f32 = _NEEDS_F32[name]

    def apply(x):
        orig_shape = x.shape
        dtype = x.dtype
        itemsize = jnp.dtype(dtype).itemsize
        D = int(orig_shape[-1])
        N = int(np.prod(orig_shape[:-1])) if len(orig_shape) > 1 else 1

        if glu:
            if D % 2 != 0:
                raise ValueError("GLU requires an even last dimension")
            d = D // 2
            x2 = x.reshape(N, D)

            if d % 128 == 0:
                # Split gate/val at the BlockSpec level (two aligned tiles).
                tile = _pick_row_tile(N, d * itemsize)
                grid = pl.cdiv(N, tile)
                padded = grid * tile
                if padded != N:
                    x2 = jnp.pad(x2, ((0, padded - N), (0, 0)))
                out = pl.pallas_call(
                    _make_glu_split_kernel(fn, needs_f32),
                    out_shape=jax.ShapeDtypeStruct((padded, d), dtype),
                    grid_spec=pl.GridSpec(
                        grid=(grid,),
                        in_specs=[
                            pl.BlockSpec((tile, d), lambda i: (i, 0)),  # gate half
                            pl.BlockSpec((tile, d), lambda i: (i, 1)),  # val half
                        ],
                        out_specs=pl.BlockSpec((tile, d), lambda i: (i, 0)),
                    ),
                    compiler_params=_COMPILER_PARAMS,
                )(x2, x2)
            else:
                # Lane-unaligned halves: full-row block, slice inside kernel.
                tile = _pick_row_tile(N, D * itemsize)
                grid = pl.cdiv(N, tile)
                padded = grid * tile
                if padded != N:
                    x2 = jnp.pad(x2, ((0, padded - N), (0, 0)))
                out = pl.pallas_call(
                    _make_glu_fused_kernel(fn, needs_f32),
                    out_shape=jax.ShapeDtypeStruct((padded, d), dtype),
                    grid_spec=pl.GridSpec(
                        grid=(grid,),
                        in_specs=[pl.BlockSpec((tile, D), lambda i: (i, 0))],
                        out_specs=pl.BlockSpec((tile, d), lambda i: (i, 0)),
                    ),
                    compiler_params=_COMPILER_PARAMS,
                )(x2)

            if padded != N:
                out = out[:N]
            return out.reshape(*orig_shape[:-1], d)

        # ---- non-GLU: pure elementwise -> lane-dense (rows, cols) slab ----
        total = int(np.prod(orig_shape))
        cols = D
        for L in _LANE_CANDIDATES:
            if total % L == 0:
                cols = L
                break
        rows = total // cols
        x2 = x.reshape(rows, cols)

        tile = _pick_row_tile(rows, cols * itemsize)
        grid = pl.cdiv(rows, tile)
        padded = grid * tile
        if padded != rows:
            x2 = jnp.pad(x2, ((0, padded - rows), (0, 0)))

        out = pl.pallas_call(
            _make_eltwise_kernel(fn, needs_f32),
            out_shape=jax.ShapeDtypeStruct((padded, cols), dtype),
            grid_spec=pl.GridSpec(
                grid=(grid,),
                in_specs=[pl.BlockSpec((tile, cols), lambda i: (i, 0))],
                out_specs=pl.BlockSpec((tile, cols), lambda i: (i, 0)),
            ),
            compiler_params=_COMPILER_PARAMS,
        )(x2)
        if padded != rows:
            out = out[:rows]
        return out.reshape(orig_shape)

    return apply


# ------------------------- pure-JAX reference (check) ------------------------
def _reference(x, name, glu):
    fn = _ACTIVATION_REGISTRY[name]
    needs_f32 = _NEEDS_F32[name]
    if glu:
        d = x.shape[-1] // 2
        gate, val = x[..., :d], x[..., d:]
        act = _activate(fn, needs_f32, gate)
        return (val * act).astype(x.dtype)
    return _activate(fn, needs_f32, x).astype(x.dtype)


# ---------------------------------- main -------------------------------------
if __name__ == "__main__":
    key = jax.random.PRNGKey(0)
    k1, k2, k3 = jax.random.split(key, 3)
    test_inputs = [
        jax.random.normal(k1, (2, 8, 64), dtype=jnp.float32),   # GLU d=32  -> fused path
        jax.random.normal(k2, (2, 8, 256), dtype=jnp.float32),  # GLU d=128 -> split path
        jax.random.normal(k3, (3, 5, 256), dtype=jnp.float32),  # ragged rows -> padded grid
    ]

    ok = True
    for x in test_inputs:
        for name in ("silu", "gelu", "relu", "none"):
            for glu in (False, True):
                act = make_activation(name, glu=glu)
                y = jax.block_until_ready(act(x))
                y_ref = _reference(x, name, glu)
                out_d = x.shape[-1] // 2 if glu else x.shape[-1]
                if y.shape != x.shape[:-1] + (out_d,):
                    ok = False
                if not np.allclose(np.asarray(y), np.asarray(y_ref),
                                   atol=1e-5, rtol=1e-5):
                    ok = False

    print("KERNEL_OK" if ok else "KERNEL_MISMATCH")
</pallas_src>

<mosaic_0001>
module attributes {stable_mosaic.version = 11 : i64} {
  func.func @kernel(%arg0: i32, %arg1: memref<1x1024xf32, #tpu.memory_space<vmem>>, %arg2: memref<1x1024xf32, #tpu.memory_space<vmem>>) attributes {dimension_semantics = [#tpu.dimension_semantics<parallel>], iteration_bounds = array<i64: 1>, scalar_prefetch = 0 : i64, scratch_operands = 0 : i64, tpu.core_type = #tpu.core_type<tc>, window_params = [{transform_indices = @transform_0, window_bounds = array<i64: 1, 1024>}, {transform_indices = @transform_1, window_bounds = array<i64: 1, 1024>}]} {
    %c0 = arith.constant 0 : index
    %c0_0 = arith.constant 0 : index
    %0 = vector.load %arg1[%c0, %c0_0] : memref<1x1024xf32, #tpu.memory_space<vmem>>, vector<1x1024xf32>
    %1 = arith.negf %0 : vector<1x1024xf32>
    %2 = math.exp %1 : vector<1x1024xf32>
    %cst = arith.constant 1.000000e+00 : f32
    %3 = vector.broadcast %cst : f32 to vector<1x1024xf32>
    %4 = arith.addf %3, %2 : vector<1x1024xf32>
    %5 = arith.divf %3, %4 : vector<1x1024xf32>
    %6 = arith.mulf %0, %5 : vector<1x1024xf32>
    %c0_1 = arith.constant 0 : index
    %c0_2 = arith.constant 0 : index
    %7 = vector.load %arg2[%c0_1, %c0_2] : memref<1x1024xf32, #tpu.memory_space<vmem>>, vector<1x1024xf32>
    tpu.vector_store %arg2[%c0_1, %c0_2], %6 {strides = array<i32>} : memref<1x1024xf32, #tpu.memory_space<vmem>>, vector<1x1024xf32>,
    return
  }
  func.func @transform_0(%arg0: i32) -> (i32, i32) {
    %c0_i32 = arith.constant 0 : i32
    %c0_i32_0 = arith.constant 0 : i32
    return %arg0, %c0_i32 : i32, i32
  }
  func.func @transform_1(%arg0: i32) -> (i32, i32) {
    %c0_i32 = arith.constant 0 : i32
    %c0_i32_0 = arith.constant 0 : i32
    return %arg0, %c0_i32 : i32, i32
  }
}

</mosaic_0001>

<bundles_post_ra>
// kernel: tpu_custom_call.1
= control target key start
LH: loop header
LB: loop body
LE: loop exit
PB: predicated region body
PF: predicated region fallthrough
CT: control target
= control target key end

     0   :  { %6 = vsyncpa [#allocation3], 0  ;;  %s136_s0 = inlined_call_operand.hbm [shape: f32[1,1024], index: 0, kind: input, shape index: {}]   ;;  %s137_s1 = inlined_call_operand.hbm [shape: f32[1,1024], index: 1, kind: output, shape index: {}]  }
   0x1   :  { %7 = vsyncpa [#allocation4], 0  ;;  %s100_s6 = smov [#allocation2]   ;;  %s52_s10 = scalar_lea.hbm %s136_s0, 128 }
   0x2   :  { %s14_s7 = sshll.u32 %s100_s6, 4  ;;  %p53_p0 = scmp.ne.s32.totalorder %s136_s0, %s52_s10  ;;  %s15_s7 = int_to_ptr.vmem [resolvable:$true] %s14_s7 }
   0x3   :  { %p56_p1 = scmp.lt.u32.totalorder %s52_s10, %s136_s0 }
   0x5   :  { %p58_p2 = pnand %p56_p1, %p53_p0 }
   0x7   :  { %61 = shalt.err (!%p58_p2)
}
   0x8   :  { %s62_s15 = scalar_lea.vmem %s15_s7, 128  ;;  %p67_p4 = scmp.lt.s32.totalorder %s15_s7, %s15_s7 }
   0x9   :  { %p63_p3 = scmp.ne.s32.totalorder %s15_s7, %s62_s15  ;;  %p68_p5 = scmp.lt.s32.totalorder %s62_s15, %s62_s15 }
   0xb   :  { %p69_p6 = por %p68_p5, %p67_p4 }
   0xd   :  { %p70_p7 = pnand %p69_p6, %p63_p3 }
   0xf   :  { %73 = shalt.err (!%p70_p7)
}
  0x10   :  { %17 = dma.hbm_to_vmem [thread:$0]  %s136_s0, 128, %s15_s7, [#allocation3]  }
  0x11   :  { %96 = dma.done.wait [#allocation3], 128  }
  0x12   :  { %97 = vsyncadd [#allocation3], 4294967168  ;;  %v21_v0 = vld [vmem:[#allocation2] sm:$0xff]  ;;  %s101_s18 = smov [#allocation5]  }
  0x13   :  { %v45_v1 = vmul.f32 -1.442695, %v21_v0  ;;  %s36_s19 = sshll.u32 %s101_s18, 4  ;;  %s37_s19 = int_to_ptr.vmem [resolvable:$true] %s36_s19 }
  0x14   :  { %s74_s20 = scalar_lea.vmem %s37_s19, 128  ;;  %p79_p9 = scmp.lt.s32.totalorder %s37_s19, %s37_s19 }
  0x15   :  { %48 = vpow2.f32 %v45_v1  ;;  %p75_p8 = scmp.ne.s32.totalorder %s37_s19, %s74_s20  ;;  %p80_p10 = scmp.lt.s32.totalorder %s74_s20, %s74_s20 }
  0x17   :  { %p81_p11 = por %p80_p10, %p79_p9 }
  0x19   :  { %p82_p12 = pnand %p81_p11, %p75_p8 }
  0x1f   :  { %v49_v2 = vpop.eup %48 }
  0x20   :  { %v25_v3 = vadd.f32 1.0, %v49_v2 }
  0x22   :  { %50 = vrcp.f32 %v25_v3 }
  0x2c   :  { %v51_v4 = vpop.eup %50 }
  0x2d   :  { %v28_v5 = vmul.f32 %v51_v4, %v21_v0 }
  0x2f   :  { %29 = vst [vmem:[#allocation5] sm:$0xff] %v28_v5 }
  0x30   :  { %85 = shalt.err (!%p82_p12)
}
  0x31   :  { %s86_s22 = scalar_lea.hbm %s137_s1, 128 }
  0x32   :  { %p87_p13 = scmp.ne.s32.totalorder %s137_s1, %s86_s22  ;;  %p90_p0 = scmp.lt.u32.totalorder %s86_s22, %s137_s1 }
  0x34   :  { %p92_p1 = pnand %p90_p0, %p87_p13 }
  0x36   :  { %95 = shalt.err (!%p92_p1)
}
  0x37   :  { %39 = dma.vmem_to_hbm [thread:$0]  %s37_s19, 128, %s137_s1, [#allocation4]  }
  0x38   :  { %98 = dma.done.wait [#allocation4], 128  }
  0x39   :  { %99 = vsyncadd [#allocation4], 4294967168 }
  0x3a   :  { %43 = vsyncpa [#allocation3], 1 }
  0x3b   :  { %44 = vsyncpa [#allocation4], 1 }

</bundles_post_ra>
